<compile_context>
chip_gen: v7x
topology: tpu7x:2x2x1
jax: 0.10.0
libtpu: 0.0.40
codegen_flags: <defaults>
</compile_context>

<pallas_src>
import jax
import jax.numpy as jnp
from jax.experimental import pallas as pl
from jax.experimental.pallas import tpu as pltpu

HIDDEN = 32
OUT_PAD = 128   # lane-dense padded width for the final head output


# ----------------------------- Pallas kernel -------------------------------

def _full_spec(shape):
    """Block = the whole array, single grid step."""
    n = len(shape)
    return pl.BlockSpec(shape, lambda i, n=n: (0,) * n)


def _agg(A, xs, wl):
    """A_norm @ x_src @ Wl with the MXU-cheaper association (static shape choice)."""
    if xs.shape[-1] <= wl.shape[-1]:
        t = jnp.dot(A, xs, preferred_element_type=jnp.float32)
        return jnp.dot(t, wl, preferred_element_type=jnp.float32)
    t = jnp.dot(xs, wl, preferred_element_type=jnp.float32)
    return jnp.dot(A, t, preferred_element_type=jnp.float32)


def fused_hetero_sage_kernel(
        xp_ref, xa_ref, app_ref, aap_ref, apa_ref,
        wl1pp_ref, wl1ap_ref, wr1p_ref, b1p_ref,
        wl1pa_ref, wr1a_ref, b1a_ref,
        wl2pp_ref, wl2ap_ref, wr2p_ref, b2p_ref,
        wlin_ref, blin_ref,
        o_ref):
    xp = xp_ref[...]       # (Np, Fp) paper features
    xa = xa_ref[...]       # (Na, Fa) author features
    app = app_ref[...]     # (Np, Np) row-normalized adj: paper -> paper
    aap = aap_ref[...]     # (Np, Na) author -> paper
    apa = apa_ref[...]     # (Na, Np) paper -> author

    # ---- conv1, dst='paper': sum over edge types (pp, ap); Wr/b pre-summed ----
    h1p = (_agg(app, xp, wl1pp_ref[...])
           + _agg(aap, xa, wl1ap_ref[...])
           + jnp.dot(xp, wr1p_ref[...], preferred_element_type=jnp.float32)
           + b1p_ref[...])
    h1p = jnp.maximum(h1p, 0.0)

    # ---- conv1, dst='author': single edge type (pa) ----
    h1a = (_agg(apa, xp, wl1pa_ref[...])
           + jnp.dot(xa, wr1a_ref[...], preferred_element_type=jnp.float32)
           + b1a_ref[...])
    h1a = jnp.maximum(h1a, 0.0)

    # ---- conv2, dst='paper' (only branch consumed by the head); no relu ----
    h2p = (_agg(app, h1p, wl2pp_ref[...])
           + _agg(aap, h1a, wl2ap_ref[...])
           + jnp.dot(h1p, wr2p_ref[...], preferred_element_type=jnp.float32)
           + b2p_ref[...])

    # ---- final Linear head, zero-padded to OUT_PAD lanes (unmasked store) ----
    out = jnp.dot(h2p, wlin_ref[...], preferred_element_type=jnp.float32) + blin_ref[...]
    o_ref[...] = out.astype(o_ref.dtype)


# ------------------------------- JAX glue ----------------------------------

def mean_adj(edge_index, n_src, n_dst):
    """Row-normalized dense adjacency for mean aggregation (0 rows for isolated dst)."""
    src, dst = edge_index[0], edge_index[1]
    A = jnp.zeros((n_dst, n_src), jnp.float32).at[dst, src].add(1.0)
    deg = A.sum(axis=1, keepdims=True)
    return jnp.where(deg > 0, A / jnp.maximum(deg, 1.0), 0.0)


def init_sage_params(key, f_src, f_dst, hidden):
    k1, k2 = jax.random.split(key)
    scale_l = 1.0 / jnp.sqrt(jnp.float32(f_src))
    scale_r = 1.0 / jnp.sqrt(jnp.float32(f_dst))
    return dict(
        wl=jax.random.normal(k1, (f_src, hidden), jnp.float32) * scale_l,
        wr=jax.random.normal(k2, (f_dst, hidden), jnp.float32) * scale_r,
        b=jnp.zeros((1, hidden), jnp.float32),
    )


def hetero_sage_forward(params, x_dict, edge_index_dict, sizes):
    N_paper, N_author = sizes
    A_pp = mean_adj(edge_index_dict['pp'], N_paper, N_paper)    # paper  -> paper
    A_ap = mean_adj(edge_index_dict['ap'], N_author, N_paper)   # author -> paper
    A_pa = mean_adj(edge_index_dict['pa'], N_paper, N_author)   # paper  -> author

    x_p, x_a = x_dict['paper'], x_dict['author']
    p1, p2 = params['conv1'], params['conv2']

    # Fold per-edge-type root weights / biases into single matmul + add per layer.
    wr1p = p1['pp']['wr'] + p1['ap']['wr']
    b1p = p1['pp']['b'] + p1['ap']['b']
    wr1a = p1['pa']['wr']
    b1a = p1['pa']['b']
    wr2p = p2['pp']['wr'] + p2['ap']['wr']
    b2p = p2['pp']['b'] + p2['ap']['b']

    # Pad head to 128 output lanes (lane-dense store); slice back afterwards.
    w_lin = params['lin']['w']   # (HIDDEN, out_f)
    b_lin = params['lin']['b']   # (1, out_f)
    out_f = w_lin.shape[1]
    w_lin_pad = jnp.zeros((HIDDEN, OUT_PAD), jnp.float32).at[:, :out_f].set(w_lin)
    b_lin_pad = jnp.zeros((1, OUT_PAD), jnp.float32).at[:, :out_f].set(b_lin)

    inputs = [x_p, x_a, A_pp, A_ap, A_pa,
              p1['pp']['wl'], p1['ap']['wl'], wr1p, b1p,
              p1['pa']['wl'], wr1a, b1a,
              p2['pp']['wl'], p2['ap']['wl'], wr2p, b2p,
              w_lin_pad, b_lin_pad]

    out_pad = pl.pallas_call(
        fused_hetero_sage_kernel,
        out_shape=jax.ShapeDtypeStruct((N_paper, OUT_PAD), jnp.float32),
        grid=(1,),
        in_specs=[_full_spec(a.shape) for a in inputs],
        out_specs=_full_spec((N_paper, OUT_PAD)),
        compiler_params=pltpu.CompilerParams(
            dimension_semantics=("arbitrary",)),
    )(*inputs)
    return out_pad[:, :out_f]


# --------------------------------- main -------------------------------------

if __name__ == "__main__":
    key = jax.random.PRNGKey(0)
    ks = jax.random.split(key, 16)

    # metadata: node types ['paper', 'author'];
    # edge types [('paper','to','paper'), ('author','to','paper'), ('paper','to','author')]
    N_paper, N_author = 16, 12
    F_paper, F_author = 16, 8
    E = 24

    x_paper = jax.random.normal(ks[0], (N_paper, F_paper), jnp.float32)
    x_author = jax.random.normal(ks[1], (N_author, F_author), jnp.float32)

    def rand_edges(k, n_src, n_dst, e):
        k1, k2 = jax.random.split(k)
        src = jax.random.randint(k1, (e,), 0, n_src)
        dst = jax.random.randint(k2, (e,), 0, n_dst)
        return jnp.stack([src, dst])

    edge_index_dict = {
        'pp': rand_edges(ks[2], N_paper, N_paper, E),    # ('paper','to','paper')
        'ap': rand_edges(ks[3], N_author, N_paper, E),   # ('author','to','paper')
        'pa': rand_edges(ks[4], N_paper, N_author, E),   # ('paper','to','author')
    }
    x_dict = {'paper': x_paper, 'author': x_author}

    # Deterministic parameter init (lazy (-1,-1) in_channels resolved from inputs).
    params = {
        'conv1': {
            'pp': init_sage_params(ks[5], F_paper, F_paper, HIDDEN),
            'ap': init_sage_params(ks[6], F_author, F_paper, HIDDEN),
            'pa': init_sage_params(ks[7], F_paper, F_author, HIDDEN),
        },
        'conv2': {
            'pp': init_sage_params(ks[8], HIDDEN, HIDDEN, HIDDEN),
            'ap': init_sage_params(ks[9], HIDDEN, HIDDEN, HIDDEN),
            'pa': init_sage_params(ks[10], HIDDEN, HIDDEN, HIDDEN),
        },
        'lin': {
            'w': jax.random.normal(ks[11], (HIDDEN, 1), jnp.float32) / jnp.sqrt(32.0),
            'b': jnp.zeros((1, 1), jnp.float32),
        },
    }

    out = hetero_sage_forward(params, x_dict, edge_index_dict, (N_paper, N_author))
    out = jax.block_until_ready(out)
    assert out.shape == (N_paper, 1) and out.dtype == jnp.float32
    print("KERNEL_OK")
</pallas_src>

<mosaic_0001>
module attributes {stable_mosaic.version = 11 : i64} {
  func.func @fused_hetero_sage_kernel(%arg0: i32, %arg1: memref<16x16xf32, #tpu.memory_space<vmem>>, %arg2: memref<12x8xf32, #tpu.memory_space<vmem>>, %arg3: memref<16x16xf32, #tpu.memory_space<vmem>>, %arg4: memref<16x12xf32, #tpu.memory_space<vmem>>, %arg5: memref<12x16xf32, #tpu.memory_space<vmem>>, %arg6: memref<16x32xf32, #tpu.memory_space<vmem>>, %arg7: memref<8x32xf32, #tpu.memory_space<vmem>>, %arg8: memref<16x32xf32, #tpu.memory_space<vmem>>, %arg9: memref<1x32xf32, #tpu.memory_space<vmem>>, %arg10: memref<16x32xf32, #tpu.memory_space<vmem>>, %arg11: memref<8x32xf32, #tpu.memory_space<vmem>>, %arg12: memref<1x32xf32, #tpu.memory_space<vmem>>, %arg13: memref<32x32xf32, #tpu.memory_space<vmem>>, %arg14: memref<32x32xf32, #tpu.memory_space<vmem>>, %arg15: memref<32x32xf32, #tpu.memory_space<vmem>>, %arg16: memref<1x32xf32, #tpu.memory_space<vmem>>, %arg17: memref<32x128xf32, #tpu.memory_space<vmem>>, %arg18: memref<1x128xf32, #tpu.memory_space<vmem>>, %arg19: memref<16x128xf32, #tpu.memory_space<vmem>>) attributes {dimension_semantics = [#tpu.dimension_semantics<arbitrary>], iteration_bounds = array<i64: 1>, scalar_prefetch = 0 : i64, scratch_operands = 0 : i64, tpu.core_type = #tpu.core_type<tc>, window_params = [{pipeline_mode = #tpu.pipeline_mode<synchronous>, transform_indices = @transform_0, window_bounds = array<i64: 16, 16>}, {pipeline_mode = #tpu.pipeline_mode<synchronous>, transform_indices = @transform_1, window_bounds = array<i64: 12, 8>}, {pipeline_mode = #tpu.pipeline_mode<synchronous>, transform_indices = @transform_2, window_bounds = array<i64: 16, 16>}, {pipeline_mode = #tpu.pipeline_mode<synchronous>, transform_indices = @transform_3, window_bounds = array<i64: 16, 12>}, {pipeline_mode = #tpu.pipeline_mode<synchronous>, transform_indices = @transform_4, window_bounds = array<i64: 12, 16>}, {pipeline_mode = #tpu.pipeline_mode<synchronous>, transform_indices = @transform_5, window_bounds = array<i64: 16, 32>}, {pipeline_mode = #tpu.pipeline_mode<synchronous>, transform_indices = @transform_6, window_bounds = array<i64: 8, 32>}, {pipeline_mode = #tpu.pipeline_mode<synchronous>, transform_indices = @transform_7, window_bounds = array<i64: 16, 32>}, {pipeline_mode = #tpu.pipeline_mode<synchronous>, transform_indices = @transform_8, window_bounds = array<i64: 1, 32>}, {pipeline_mode = #tpu.pipeline_mode<synchronous>, transform_indices = @transform_9, window_bounds = array<i64: 16, 32>}, {pipeline_mode = #tpu.pipeline_mode<synchronous>, transform_indices = @transform_10, window_bounds = array<i64: 8, 32>}, {pipeline_mode = #tpu.pipeline_mode<synchronous>, transform_indices = @transform_11, window_bounds = array<i64: 1, 32>}, {pipeline_mode = #tpu.pipeline_mode<synchronous>, transform_indices = @transform_12, window_bounds = array<i64: 32, 32>}, {pipeline_mode = #tpu.pipeline_mode<synchronous>, transform_indices = @transform_13, window_bounds = array<i64: 32, 32>}, {pipeline_mode = #tpu.pipeline_mode<synchronous>, transform_indices = @transform_14, window_bounds = array<i64: 32, 32>}, {pipeline_mode = #tpu.pipeline_mode<synchronous>, transform_indices = @transform_15, window_bounds = array<i64: 1, 32>}, {pipeline_mode = #tpu.pipeline_mode<synchronous>, transform_indices = @transform_16, window_bounds = array<i64: 32, 128>}, {pipeline_mode = #tpu.pipeline_mode<synchronous>, transform_indices = @transform_17, window_bounds = array<i64: 1, 128>}, {pipeline_mode = #tpu.pipeline_mode<synchronous>, transform_indices = @transform_18, window_bounds = array<i64: 16, 128>}]} {
    %c0 = arith.constant 0 : index
    %c0_0 = arith.constant 0 : index
    %0 = vector.load %arg1[%c0, %c0_0] : memref<16x16xf32, #tpu.memory_space<vmem>>, vector<16x16xf32>
    %c0_1 = arith.constant 0 : index
    %c0_2 = arith.constant 0 : index
    %1 = vector.load %arg2[%c0_1, %c0_2] : memref<12x8xf32, #tpu.memory_space<vmem>>, vector<12x8xf32>
    %c0_3 = arith.constant 0 : index
    %c0_4 = arith.constant 0 : index
    %2 = vector.load %arg3[%c0_3, %c0_4] : memref<16x16xf32, #tpu.memory_space<vmem>>, vector<16x16xf32>
    %c0_5 = arith.constant 0 : index
    %c0_6 = arith.constant 0 : index
    %3 = vector.load %arg4[%c0_5, %c0_6] : memref<16x12xf32, #tpu.memory_space<vmem>>, vector<16x12xf32>
    %c0_7 = arith.constant 0 : index
    %c0_8 = arith.constant 0 : index
    %4 = vector.load %arg5[%c0_7, %c0_8] : memref<12x16xf32, #tpu.memory_space<vmem>>, vector<12x16xf32>
    %c0_9 = arith.constant 0 : index
    %c0_10 = arith.constant 0 : index
    %5 = vector.load %arg6[%c0_9, %c0_10] : memref<16x32xf32, #tpu.memory_space<vmem>>, vector<16x32xf32>
    %cst = arith.constant dense<0.000000e+00> : vector<16x16xf32>
    %6 = tpu.matmul %2, %0, %cst {dimension_numbers = #tpu.dot_dimension_numbers<[1], [0], [0], [1], [0, 0, 1, 1], [], []>} : vector<16x16xf32>, vector<16x16xf32>, vector<16x16xf32> -> vector<16x16xf32>
    %cst_11 = arith.constant dense<0.000000e+00> : vector<16x32xf32>
    %7 = tpu.matmul %6, %5, %cst_11 {dimension_numbers = #tpu.dot_dimension_numbers<[1], [0], [0], [1], [0, 0, 1, 1], [], []>} : vector<16x16xf32>, vector<16x32xf32>, vector<16x32xf32> -> vector<16x32xf32>
    %c0_12 = arith.constant 0 : index
    %c0_13 = arith.constant 0 : index
    %8 = vector.load %arg7[%c0_12, %c0_13] : memref<8x32xf32, #tpu.memory_space<vmem>>, vector<8x32xf32>
    %cst_14 = arith.constant dense<0.000000e+00> : vector<16x8xf32>
    %9 = tpu.matmul %3, %1, %cst_14 {dimension_numbers = #tpu.dot_dimension_numbers<[1], [0], [0], [1], [0, 0, 1, 1], [], []>} : vector<16x12xf32>, vector<12x8xf32>, vector<16x8xf32> -> vector<16x8xf32>
    %cst_15 = arith.constant dense<0.000000e+00> : vector<16x32xf32>
    %10 = tpu.matmul %9, %8, %cst_15 {dimension_numbers = #tpu.dot_dimension_numbers<[1], [0], [0], [1], [0, 0, 1, 1], [], []>} : vector<16x8xf32>, vector<8x32xf32>, vector<16x32xf32> -> vector<16x32xf32>
    %11 = arith.addf %7, %10 : vector<16x32xf32>
    %c0_16 = arith.constant 0 : index
    %c0_17 = arith.constant 0 : index
    %12 = vector.load %arg8[%c0_16, %c0_17] : memref<16x32xf32, #tpu.memory_space<vmem>>, vector<16x32xf32>
    %cst_18 = arith.constant dense<0.000000e+00> : vector<16x32xf32>
    %13 = tpu.matmul %0, %12, %cst_18 {dimension_numbers = #tpu.dot_dimension_numbers<[1], [0], [0], [1], [0, 0, 1, 1], [], []>} : vector<16x16xf32>, vector<16x32xf32>, vector<16x32xf32> -> vector<16x32xf32>
    %14 = arith.addf %11, %13 : vector<16x32xf32>
    %c0_19 = arith.constant 0 : index
    %c0_20 = arith.constant 0 : index
    %15 = vector.load %arg9[%c0_19, %c0_20] : memref<1x32xf32, #tpu.memory_space<vmem>>, vector<1x32xf32>
    %16 = vector.broadcast %15 : vector<1x32xf32> to vector<16x32xf32>
    %17 = arith.addf %14, %16 : vector<16x32xf32>
    %cst_21 = arith.constant 0.000000e+00 : f32
    %18 = vector.broadcast %cst_21 : f32 to vector<16x32xf32>
    %19 = arith.maximumf %17, %18 : vector<16x32xf32>
    %c0_22 = arith.constant 0 : index
    %c0_23 = arith.constant 0 : index
    %20 = vector.load %arg10[%c0_22, %c0_23] : memref<16x32xf32, #tpu.memory_space<vmem>>, vector<16x32xf32>
    %cst_24 = arith.constant dense<0.000000e+00> : vector<12x16xf32>
    %21 = tpu.matmul %4, %0, %cst_24 {dimension_numbers = #tpu.dot_dimension_numbers<[1], [0], [0], [1], [0, 0, 1, 1], [], []>} : vector<12x16xf32>, vector<16x16xf32>, vector<12x16xf32> -> vector<12x16xf32>
    %cst_25 = arith.constant dense<0.000000e+00> : vector<12x32xf32>
    %22 = tpu.matmul %21, %20, %cst_25 {dimension_numbers = #tpu.dot_dimension_numbers<[1], [0], [0], [1], [0, 0, 1, 1], [], []>} : vector<12x16xf32>, vector<16x32xf32>, vector<12x32xf32> -> vector<12x32xf32>
    %c0_26 = arith.constant 0 : index
    %c0_27 = arith.constant 0 : index
    %23 = vector.load %arg11[%c0_26, %c0_27] : memref<8x32xf32, #tpu.memory_space<vmem>>, vector<8x32xf32>
    %cst_28 = arith.constant dense<0.000000e+00> : vector<12x32xf32>
    %24 = tpu.matmul %1, %23, %cst_28 {dimension_numbers = #tpu.dot_dimension_numbers<[1], [0], [0], [1], [0, 0, 1, 1], [], []>} : vector<12x8xf32>, vector<8x32xf32>, vector<12x32xf32> -> vector<12x32xf32>
    %25 = arith.addf %22, %24 : vector<12x32xf32>
    %c0_29 = arith.constant 0 : index
    %c0_30 = arith.constant 0 : index
    %26 = vector.load %arg12[%c0_29, %c0_30] : memref<1x32xf32, #tpu.memory_space<vmem>>, vector<1x32xf32>
    %27 = vector.broadcast %26 : vector<1x32xf32> to vector<12x32xf32>
    %28 = arith.addf %25, %27 : vector<12x32xf32>
    %cst_31 = arith.constant 0.000000e+00 : f32
    %29 = vector.broadcast %cst_31 : f32 to vector<12x32xf32>
    %30 = arith.maximumf %28, %29 : vector<12x32xf32>
    %c0_32 = arith.constant 0 : index
    %c0_33 = arith.constant 0 : index
    %31 = vector.load %arg13[%c0_32, %c0_33] : memref<32x32xf32, #tpu.memory_space<vmem>>, vector<32x32xf32>
    %cst_34 = arith.constant dense<0.000000e+00> : vector<16x32xf32>
    %32 = tpu.matmul %2, %19, %cst_34 {dimension_numbers = #tpu.dot_dimension_numbers<[1], [0], [0], [1], [0, 0, 1, 1], [], []>} : vector<16x16xf32>, vector<16x32xf32>, vector<16x32xf32> -> vector<16x32xf32>
    %cst_35 = arith.constant dense<0.000000e+00> : vector<16x32xf32>
    %33 = tpu.matmul %32, %31, %cst_35 {dimension_numbers = #tpu.dot_dimension_numbers<[1], [0], [0], [1], [0, 0, 1, 1], [], []>} : vector<16x32xf32>, vector<32x32xf32>, vector<16x32xf32> -> vector<16x32xf32>
    %c0_36 = arith.constant 0 : index
    %c0_37 = arith.constant 0 : index
    %34 = vector.load %arg14[%c0_36, %c0_37] : memref<32x32xf32, #tpu.memory_space<vmem>>, vector<32x32xf32>
    %cst_38 = arith.constant dense<0.000000e+00> : vector<16x32xf32>
    %35 = tpu.matmul %3, %30, %cst_38 {dimension_numbers = #tpu.dot_dimension_numbers<[1], [0], [0], [1], [0, 0, 1, 1], [], []>} : vector<16x12xf32>, vector<12x32xf32>, vector<16x32xf32> -> vector<16x32xf32>
    %cst_39 = arith.constant dense<0.000000e+00> : vector<16x32xf32>
    %36 = tpu.matmul %35, %34, %cst_39 {dimension_numbers = #tpu.dot_dimension_numbers<[1], [0], [0], [1], [0, 0, 1, 1], [], []>} : vector<16x32xf32>, vector<32x32xf32>, vector<16x32xf32> -> vector<16x32xf32>
    %37 = arith.addf %33, %36 : vector<16x32xf32>
    %c0_40 = arith.constant 0 : index
    %c0_41 = arith.constant 0 : index
    %38 = vector.load %arg15[%c0_40, %c0_41] : memref<32x32xf32, #tpu.memory_space<vmem>>, vector<32x32xf32>
    %cst_42 = arith.constant dense<0.000000e+00> : vector<16x32xf32>
    %39 = tpu.matmul %19, %38, %cst_42 {dimension_numbers = #tpu.dot_dimension_numbers<[1], [0], [0], [1], [0, 0, 1, 1], [], []>} : vector<16x32xf32>, vector<32x32xf32>, vector<16x32xf32> -> vector<16x32xf32>
    %40 = arith.addf %37, %39 : vector<16x32xf32>
    %c0_43 = arith.constant 0 : index
    %c0_44 = arith.constant 0 : index
    %41 = vector.load %arg16[%c0_43, %c0_44] : memref<1x32xf32, #tpu.memory_space<vmem>>, vector<1x32xf32>
    %42 = vector.broadcast %41 : vector<1x32xf32> to vector<16x32xf32>
    %43 = arith.addf %40, %42 : vector<16x32xf32>
    %c0_45 = arith.constant 0 : index
    %c0_46 = arith.constant 0 : index
    %44 = vector.load %arg17[%c0_45, %c0_46] : memref<32x128xf32, #tpu.memory_space<vmem>>, vector<32x128xf32>
    %cst_47 = arith.constant dense<0.000000e+00> : vector<16x128xf32>
    %45 = tpu.matmul %43, %44, %cst_47 {dimension_numbers = #tpu.dot_dimension_numbers<[1], [0], [0], [1], [0, 0, 1, 1], [], []>} : vector<16x32xf32>, vector<32x128xf32>, vector<16x128xf32> -> vector<16x128xf32>
    %c0_48 = arith.constant 0 : index
    %c0_49 = arith.constant 0 : index
    %46 = vector.load %arg18[%c0_48, %c0_49] : memref<1x128xf32, #tpu.memory_space<vmem>>, vector<1x128xf32>
    %47 = vector.broadcast %46 : vector<1x128xf32> to vector<16x128xf32>
    %48 = arith.addf %45, %47 : vector<16x128xf32>
    %c0_50 = arith.constant 0 : index
    %c0_51 = arith.constant 0 : index
    %49 = vector.load %arg19[%c0_50, %c0_51] : memref<16x128xf32, #tpu.memory_space<vmem>>, vector<16x128xf32>
    tpu.vector_store %arg19[%c0_50, %c0_51], %48 {strides = array<i32>} : memref<16x128xf32, #tpu.memory_space<vmem>>, vector<16x128xf32>,
    return
  }
  func.func @transform_0(%arg0: i32) -> (i32, i32) {
    %c0_i32 = arith.constant 0 : i32
    %c0_i32_0 = arith.constant 0 : i32
    %c0_i32_1 = arith.constant 0 : i32
    return %c0_i32, %c0_i32_0 : i32, i32
  }
  func.func @transform_1(%arg0: i32) -> (i32, i32) {
    %c0_i32 = arith.constant 0 : i32
    %c0_i32_0 = arith.constant 0 : i32
    %c0_i32_1 = arith.constant 0 : i32
    return %c0_i32, %c0_i32_0 : i32, i32
  }
  func.func @transform_2(%arg0: i32) -> (i32, i32) {
    %c0_i32 = arith.constant 0 : i32
    %c0_i32_0 = arith.constant 0 : i32
    %c0_i32_1 = arith.constant 0 : i32
    return %c0_i32, %c0_i32_0 : i32, i32
  }
  func.func @transform_3(%arg0: i32) -> (i32, i32) {
    %c0_i32 = arith.constant 0 : i32
    %c0_i32_0 = arith.constant 0 : i32
    %c0_i32_1 = arith.constant 0 : i32
    return %c0_i32, %c0_i32_0 : i32, i32
  }
  func.func @transform_4(%arg0: i32) -> (i32, i32) {
    %c0_i32 = arith.constant 0 : i32
    %c0_i32_0 = arith.constant 0 : i32
    %c0_i32_1 = arith.constant 0 : i32
    return %c0_i32, %c0_i32_0 : i32, i32
  }
  func.func @transform_5(%arg0: i32) -> (i32, i32) {
    %c0_i32 = arith.constant 0 : i32
    %c0_i32_0 = arith.constant 0 : i32
    %c0_i32_1 = arith.constant 0 : i32
    return %c0_i32, %c0_i32_0 : i32, i32
  }
  func.func @transform_6(%arg0: i32) -> (i32, i32) {
    %c0_i32 = arith.constant 0 : i32
    %c0_i32_0 = arith.constant 0 : i32
    %c0_i32_1 = arith.constant 0 : i32
    return %c0_i32, %c0_i32_0 : i32, i32
  }
  func.func @transform_7(%arg0: i32) -> (i32, i32) {
    %c0_i32 = arith.constant 0 : i32
    %c0_i32_0 = arith.constant 0 : i32
    %c0_i32_1 = arith.constant 0 : i32
    return %c0_i32, %c0_i32_0 : i32, i32
  }
  func.func @transform_8(%arg0: i32) -> (i32, i32) {
    %c0_i32 = arith.constant 0 : i32
    %c0_i32_0 = arith.constant 0 : i32
    %c0_i32_1 = arith.constant 0 : i32
    return %c0_i32, %c0_i32_0 : i32, i32
  }
  func.func @transform_9(%arg0: i32) -> (i32, i32) {
    %c0_i32 = arith.constant 0 : i32
    %c0_i32_0 = arith.constant 0 : i32
    %c0_i32_1 = arith.constant 0 : i32
    return %c0_i32, %c0_i32_0 : i32, i32
  }
  func.func @transform_10(%arg0: i32) -> (i32, i32) {
    %c0_i32 = arith.constant 0 : i32
    %c0_i32_0 = arith.constant 0 : i32
    %c0_i32_1 = arith.constant 0 : i32
    return %c0_i32, %c0_i32_0 : i32, i32
  }
  func.func @transform_11(%arg0: i32) -> (i32, i32) {
    %c0_i32 = arith.constant 0 : i32
    %c0_i32_0 = arith.constant 0 : i32
    %c0_i32_1 = arith.constant 0 : i32
    return %c0_i32, %c0_i32_0 : i32, i32
  }
  func.func @transform_12(%arg0: i32) -> (i32, i32) {
    %c0_i32 = arith.constant 0 : i32
    %c0_i32_0 = arith.constant 0 : i32
    %c0_i32_1 = arith.constant 0 : i32
    return %c0_i32, %c0_i32_0 : i32, i32
  }
  func.func @transform_13(%arg0: i32) -> (i32, i32) {
    %c0_i32 = arith.constant 0 : i32
    %c0_i32_0 = arith.constant 0 : i32
    %c0_i32_1 = arith.constant 0 : i32
    return %c0_i32, %c0_i32_0 : i32, i32
  }
  func.func @transform_14(%arg0: i32) -> (i32, i32) {
    %c0_i32 = arith.constant 0 : i32
    %c0_i32_0 = arith.constant 0 : i32
    %c0_i32_1 = arith.constant 0 : i32
    return %c0_i32, %c0_i32_0 : i32, i32
  }
  func.func @transform_15(%arg0: i32) -> (i32, i32) {
    %c0_i32 = arith.constant 0 : i32
    %c0_i32_0 = arith.constant 0 : i32
    %c0_i32_1 = arith.constant 0 : i32
    return %c0_i32, %c0_i32_0 : i32, i32
  }
  func.func @transform_16(%arg0: i32) -> (i32, i32) {
    %c0_i32 = arith.constant 0 : i32
    %c0_i32_0 = arith.constant 0 : i32
    %c0_i32_1 = arith.constant 0 : i32
    return %c0_i32, %c0_i32_0 : i32, i32
  }
  func.func @transform_17(%arg0: i32) -> (i32, i32) {
    %c0_i32 = arith.constant 0 : i32
    %c0_i32_0 = arith.constant 0 : i32
    %c0_i32_1 = arith.constant 0 : i32
    return %c0_i32, %c0_i32_0 : i32, i32
  }
  func.func @transform_18(%arg0: i32) -> (i32, i32) {
    %c0_i32 = arith.constant 0 : i32
    %c0_i32_0 = arith.constant 0 : i32
    %c0_i32_1 = arith.constant 0 : i32
    return %c0_i32, %c0_i32_0 : i32, i32
  }
}

</mosaic_0001>

<bundles_post_ra>
// kernel: tpu_custom_call.1
= control target key start
LH: loop header
LB: loop body
LE: loop exit
PB: predicated region body
PF: predicated region fallthrough
CT: control target
= control target key end

     0   :  { %s2471_s0 = inlined_call_operand.hbm [shape: f32[16,16], index: 0, kind: input, shape index: {}]   ;;  %s2472_s1 = inlined_call_operand.vmem [shape: f32[12,8], index: 1, kind: input, shape index: {}]   ;;  %s2473_s2 = inlined_call_operand.hbm [shape: f32[16,16], index: 2, kind: input, shape index: {}]   ;;  %s2474_s3 = inlined_call_operand.hbm [shape: f32[16,12], index: 3, kind: input, shape index: {}]   ;;  %s2475_s4 = inlined_call_operand.hbm [shape: f32[12,16], index: 4, kind: input, shape index: {}]   ;;  %s2476_s5 = inlined_call_operand.hbm [shape: f32[16,32], index: 5, kind: input, shape index: {}]   ;;  %s2477_s6 = inlined_call_operand.hbm [shape: f32[8,32], index: 6, kind: input, shape index: {}]   ;;  %s2478_s7 = inlined_call_operand.hbm [shape: f32[16,32], index: 7, kind: input, shape index: {}]   ;;  %s2479_s8 = inlined_call_operand.vmem [shape: f32[1,32], index: 8, kind: input, shape index: {}]   ;;  %s2480_s9 = inlined_call_operand.hbm [shape: f32[16,32], index: 9, kind: input, shape index: {}]   ;;  %s2481_s10 = inlined_call_operand.hbm [shape: f32[8,32], index: 10, kind: input, shape index: {}]   ;;  %s2482_s11 = inlined_call_operand.hbm [shape: f32[1,32], index: 11, kind: input, shape index: {}]   ;;  %s2483_s12 = inlined_call_operand.vmem [shape: f32[32,32], index: 12, kind: input, shape index: {}]   ;;  %s2484_s13 = inlined_call_operand.vmem [shape: f32[32,32], index: 13, kind: input, shape index: {}]   ;;  %s2485_s14 = inlined_call_operand.hbm [shape: f32[32,32], index: 14, kind: input, shape index: {}]   ;;  %s2486_s15 = inlined_call_operand.vmem [shape: f32[1,32], index: 15, kind: input, shape index: {}]   ;;  %s2487_s16 = inlined_call_operand.hbm [shape: f32[32,128], index: 16, kind: input, shape index: {}]   ;;  %s2488_s17 = inlined_call_operand.vmem [shape: f32[1,128], index: 17, kind: input, shape index: {}]   ;;  %s2489_s18 = inlined_call_operand.hbm [shape: f32[16,128], index: 18, kind: output, shape index: {}]  }
   0x1   :  { %2494 = sst [smem:[#allocation31_spill]] %s2471_s0 }
   0x2   :  { %2495 = sst [smem:[#allocation32_spill]] %s2472_s1 }
   0x3   :  { %2496 = sst [smem:[#allocation33_spill]] %s2473_s2 }
   0x4   :  { %2497 = sst [smem:[#allocation34_spill]] %s2489_s18 }
   0x5   :  { %23 = vsyncpa [#allocation3], 0 }
   0x6   :  { %24 = vsyncpa [#allocation6], 0 }
   0x7   :  { %25 = vsyncpa [#allocation9], 0 }
   0x8   :  { %26 = vsyncpa [#allocation12], 0 }
   0x9   :  { %27 = vsyncpa [#allocation15], 0 }
   0xa   :  { %28 = vsyncpa [#allocation18], 0 }
   0xb   :  { %29 = vsyncpa [#allocation21], 0 }
   0xc   :  { %30 = vsyncpa [#allocation4], 0  ;;  %s2052_s27 = smov [#allocation5]   ;;  %s2053_s29 = smov [#allocation8]  }
   0xd   :  { %s50_s28 = sshll.u32 %s2052_s27, 4  ;;  %s74_s30 = sshll.u32 %s2053_s29, 4  ;;  %s51_s28 = int_to_ptr.vmem [resolvable:$true] %s50_s28  ;;  %s2163_s30 = int_to_ptr.vmem [resolvable:$true] %s74_s30 }
   0xe   :  { %s2498_s1 = sld [smem:[#allocation33_spill]] }
  0x14   :  { %s1750_s20 = scalar_lea.hbm %s2498_s1, 256 }
  0x15   :  { %p1751_p0 = scmp.ne.s32.totalorder %s2498_s1, %s1750_s20  ;;  %p1754_p1 = scmp.lt.u32.totalorder %s1750_s20, %s2498_s1 }
  0x17   :  { %p1756_p2 = pnand %p1754_p1, %p1751_p0 }
  0x19   :  { %1759 = shalt.err (!%p1756_p2)
}
  0x1a   :  { %s1760_s24 = scalar_lea.vmem %s51_s28, 256  ;;  %p1765_p4 = scmp.lt.s32.totalorder %s51_s28, %s51_s28 }
  0x1b   :  { %p1761_p3 = scmp.ne.s32.totalorder %s51_s28, %s1760_s24  ;;  %p1766_p5 = scmp.lt.s32.totalorder %s1760_s24, %s1760_s24 }
  0x1d   :  { %p1767_p6 = por %p1766_p5, %p1765_p4 }
  0x1f   :  { %p1768_p7 = pnand %p1767_p6, %p1761_p3 }
  0x21   :  { %1771 = shalt.err (!%p1768_p7)
}
  0x22   :  { %s2054_s25 = smov 128   ;;  %s2055_s26 = smov 8  }
  0x23   :  { %56 = dma.hbm_to_vmem [thread:$0]  %s2498_s1, 256, %s51_s28, [#allocation6], %s2054_s25, %s2054_s25, %s2055_s26  }
  0x24   :  { %s1772_s20 = scalar_lea.hbm %s2475_s4, 256 }
  0x25   :  { %p1773_p8 = scmp.ne.s32.totalorder %s2475_s4, %s1772_s20  ;;  %p1776_p9 = scmp.lt.u32.totalorder %s1772_s20, %s2475_s4 }
  0x27   :  { %p1778_p10 = pnand %p1776_p9, %p1773_p8 }
  0x29   :  { %1781 = shalt.err (!%p1778_p10)
}
  0x2a   :  { %s1782_s24 = scalar_lea.vmem %s2163_s30, 256  ;;  %p1787_p12 = scmp.lt.s32.totalorder %s2163_s30, %s2163_s30 }
  0x2b   :  { %p1783_p11 = scmp.ne.s32.totalorder %s2163_s30, %s1782_s24  ;;  %p1788_p13 = scmp.lt.s32.totalorder %s1782_s24, %s1782_s24 }
  0x2d   :  { %p1789_p0 = por %p1788_p13, %p1787_p12 }
  0x2f   :  { %p1790_p1 = pnand %p1789_p0, %p1783_p11 }
  0x31   :  { %1793 = shalt.err (!%p1790_p1)
}
  0x32   :  { %80 = dma.hbm_to_vmem [thread:$0]  %s2475_s4, 256, %s2163_s30, [#allocation9], %s2054_s25, %s2054_s25, %s2055_s26  }
  0x33   :  { %s2056_s27 = smov [#allocation11]   ;;  %s2057_s0 = smov [#allocation14]  }
  0x34   :  { %s99_s29 = sshll.u32 %s2056_s27, 4  ;;  %s122_s19 = sshll.u32 %s2057_s0, 4  ;;  %s100_s29 = int_to_ptr.vmem [resolvable:$true] %s99_s29  ;;  %s2200_s19 = int_to_ptr.vmem [resolvable:$true] %s122_s19 }
  0x35   :  { %s1794_s22 = scalar_lea.hbm %s2477_s6, 128 }
  0x36   :  { %p1795_p2 = scmp.ne.s32.totalorder %s2477_s6, %s1794_s22  ;;  %p1798_p3 = scmp.lt.u32.totalorder %s1794_s22, %s2477_s6 }
  0x38   :  { %p1800_p4 = pnand %p1798_p3, %p1795_p2 }
  0x3a   :  { %1803 = shalt.err (!%p1800_p4)
}
  0x3b   :  { %s1804_s4 = scalar_lea.vmem %s100_s29, 128  ;;  %p1809_p6 = scmp.lt.s32.totalorder %s100_s29, %s100_s29 }
  0x3c   :  { %p1805_p5 = scmp.ne.s32.totalorder %s100_s29, %s1804_s4  ;;  %p1810_p7 = scmp.lt.s32.totalorder %s1804_s4, %s1804_s4 }
  0x3e   :  { %p1811_p8 = por %p1810_p7, %p1809_p6 }
  0x40   :  { %p1812_p9 = pnand %p1811_p8, %p1805_p5 }
  0x42   :  { %1815 = shalt.err (!%p1812_p9)
}
  0x43   :  { %102 = dma.hbm_to_vmem [thread:$0]  %s2477_s6, 128, %s100_s29, [#allocation12]  }
  0x44   :  { %s1816_s0 = scalar_lea.hbm %s2480_s9, 256 }
  0x45   :  { %p1817_p10 = scmp.ne.s32.totalorder %s2480_s9, %s1816_s0  ;;  %p1820_p11 = scmp.lt.u32.totalorder %s1816_s0, %s2480_s9 }
  0x47   :  { %p1822_p12 = pnand %p1820_p11, %p1817_p10 }
  0x49   :  { %1825 = shalt.err (!%p1822_p12)
}
  0x4a   :  { %s1826_s2 = scalar_lea.vmem %s2200_s19, 256  ;;  %p1831_p0 = scmp.lt.s32.totalorder %s2200_s19, %s2200_s19 }
  0x4b   :  { %p1827_p13 = scmp.ne.s32.totalorder %s2200_s19, %s1826_s2  ;;  %p1832_p1 = scmp.lt.s32.totalorder %s1826_s2, %s1826_s2 }
  0x4d   :  { %p1833_p2 = por %p1832_p1, %p1831_p0 }
  0x4f   :  { %p1834_p3 = pnand %p1833_p2, %p1827_p13 }
  0x51   :  { %1837 = shalt.err (!%p1834_p3)
}
  0x52   :  { %128 = dma.hbm_to_vmem [thread:$0]  %s2480_s9, 256, %s2200_s19, [#allocation15], %s2054_s25, %s2054_s25, %s2055_s26  }
  0x53   :  { %s2058_s23 = smov [#allocation17]   ;;  %s2059_s4 = smov [#allocation2]  }
  0x54   :  { %s145_s24 = sshll.u32 %s2058_s23, 4  ;;  %s36_s30 = sshll.u32 %s2059_s4, 4  ;;  %s146_s24 = int_to_ptr.vmem [resolvable:$true] %s145_s24  ;;  %s2234_s30 = int_to_ptr.vmem [resolvable:$true] %s36_s30 }
  0x55   :  { %s1838_s27 = scalar_lea.hbm %s2482_s11, 16 }
  0x56   :  { %p1839_p4 = scmp.ne.s32.totalorder %s2482_s11, %s1838_s27  ;;  %p1842_p5 = scmp.lt.u32.totalorder %s1838_s27, %s2482_s11 }
  0x58   :  { %p1844_p6 = pnand %p1842_p5, %p1839_p4 }
  0x5a   :  { %1847 = shalt.err (!%p1844_p6)
}
  0x5b   :  { %s1848_s9 = scalar_lea.vmem %s146_s24, 16  ;;  %s1852_s19 = scalar_lea.vmem %s146_s24, 32 }
  0x5c   :  { %p1849_p7 = scmp.ne.s32.totalorder %s146_s24, %s1848_s9  ;;  %p1853_p8 = scmp.lt.s32.totalorder %s146_s24, %s146_s24 }
  0x5d   :  { %p1854_p9 = scmp.lt.s32.totalorder %s1852_s19, %s1848_s9 }
  0x5f   :  { %p1855_p10 = por %p1854_p9, %p1853_p8 }
  0x61   :  { %p1856_p11 = pnand %p1855_p10, %p1849_p7 }
  0x63   :  { %1859 = shalt.err (!%p1856_p11)
}
  0x64   :  { %148 = dma.hbm_to_vmem [thread:$0]  %s2482_s11, 16, %s146_s24, [#allocation18]  }
  0x65   :  { %s2499_s23 = sld [smem:[#allocation31_spill]] }
  0x6b   :  { %s1860_s4 = scalar_lea.hbm %s2499_s23, 256 }
  0x6c   :  { %p1861_p12 = scmp.ne.s32.totalorder %s2499_s23, %s1860_s4  ;;  %p1864_p13 = scmp.lt.u32.totalorder %s1860_s4, %s2499_s23 }
  0x6e   :  { %p1866_p0 = pnand %p1864_p13, %p1861_p12 }
  0x70   :  { %1869 = shalt.err (!%p1866_p0)
}
  0x71   :  { %s1870_s20 = scalar_lea.vmem %s2234_s30, 256  ;;  %p1875_p2 = scmp.lt.s32.totalorder %s2234_s30, %s2234_s30 }
  0x72   :  { %p1871_p1 = scmp.ne.s32.totalorder %s2234_s30, %s1870_s20  ;;  %p1876_p3 = scmp.lt.s32.totalorder %s1870_s20, %s1870_s20 }
  0x74   :  { %p1877_p4 = por %p1876_p3, %p1875_p2 }
  0x76   :  { %p1878_p5 = pnand %p1877_p4, %p1871_p1 }
  0x78   :  { %1881 = shalt.err (!%p1878_p5)
}
  0x79   :  { %42 = dma.hbm_to_vmem [thread:$0]  %s2499_s23, 256, %s2234_s30, [#allocation3], %s2054_s25, %s2054_s25, %s2055_s26  }
  0x7a   :  { %s2060_s18 = smov [#allocation7]   ;;  %s2061_s9 = smov [#allocation10]  }
  0x7b   :  { %s62_s21 = sshll.u32 %s2060_s18, 4  ;;  %s86_s19 = sshll.u32 %s2061_s9, 4  ;;  %s63_s21 = int_to_ptr.vmem [resolvable:$true] %s62_s21  ;;  %s2268_s19 = int_to_ptr.vmem [resolvable:$true] %s86_s19 }
  0x7c   :  { %s1882_s6 = scalar_lea.hbm %s2474_s3, 256 }
  0x7d   :  { %p1883_p6 = scmp.ne.s32.totalorder %s2474_s3, %s1882_s6  ;;  %p1886_p7 = scmp.lt.u32.totalorder %s1882_s6, %s2474_s3 }
  0x7f   :  { %p1888_p8 = pnand %p1886_p7, %p1883_p6 }
  0x81   :  { %1891 = shalt.err (!%p1888_p8)
}
  0x82   :  { %s1892_s30 = scalar_lea.vmem %s63_s21, 256  ;;  %p1897_p10 = scmp.lt.s32.totalorder %s63_s21, %s63_s21 }
  0x83   :  { %p1893_p9 = scmp.ne.s32.totalorder %s63_s21, %s1892_s30  ;;  %p1898_p11 = scmp.lt.s32.totalorder %s1892_s30, %s1892_s30 }
  0x85   :  { %p1899_p12 = por %p1898_p11, %p1897_p10 }
  0x87   :  { %p1900_p13 = pnand %p1899_p12, %p1893_p9 }
  0x89   :  { %1903 = shalt.err (!%p1900_p13)
}
  0x8a   :  { %68 = dma.hbm_to_vmem [thread:$0]  %s2474_s3, 256, %s63_s21, [#allocation6], %s2054_s25, %s2054_s25, %s2055_s26  }
  0x8b   :  { %s1904_s11 = scalar_lea.hbm %s2476_s5, 256 }
  0x8c   :  { %p1905_p0 = scmp.ne.s32.totalorder %s2476_s5, %s1904_s11  ;;  %p1908_p1 = scmp.lt.u32.totalorder %s1904_s11, %s2476_s5 }
  0x8e   :  { %p1910_p2 = pnand %p1908_p1, %p1905_p0 }
  0x90   :  { %1913 = shalt.err (!%p1910_p2)
}
  0x91   :  { %s1914_s2 = scalar_lea.vmem %s2268_s19, 256  ;;  %p1919_p4 = scmp.lt.s32.totalorder %s2268_s19, %s2268_s19 }
  0x92   :  { %p1915_p3 = scmp.ne.s32.totalorder %s2268_s19, %s1914_s2  ;;  %p1920_p5 = scmp.lt.s32.totalorder %s1914_s2, %s1914_s2 }
  0x94   :  { %p1921_p6 = por %p1920_p5, %p1919_p4 }
  0x96   :  { %p1922_p7 = pnand %p1921_p6, %p1915_p3 }
  0x98   :  { %1925 = shalt.err (!%p1922_p7)
}
  0x99   :  { %92 = dma.hbm_to_vmem [thread:$0]  %s2476_s5, 256, %s2268_s19, [#allocation9], %s2054_s25, %s2054_s25, %s2055_s26  }
  0x9a   :  { %s2062_s6 = smov [#allocation13]   ;;  %s2063_s4 = smov [#allocation16]  }
  0x9b   :  { %s108_s29 = sshll.u32 %s2062_s6, 4  ;;  %s135_s28 = sshll.u32 %s2063_s4, 4  ;;  %s109_s29 = int_to_ptr.vmem [resolvable:$true] %s108_s29  ;;  %s136_s28 = int_to_ptr.vmem [resolvable:$true] %s135_s28 }
  0x9c   :  { %s1926_s23 = scalar_lea.hbm %s2478_s7, 256 }
  0x9d   :  { %p1927_p8 = scmp.ne.s32.totalorder %s2478_s7, %s1926_s23  ;;  %p1930_p9 = scmp.lt.u32.totalorder %s1926_s23, %s2478_s7 }
  0x9f   :  { %p1932_p10 = pnand %p1930_p9, %p1927_p8 }
  0xa1   :  { %1935 = shalt.err (!%p1932_p10)
}
  0xa2   :  { %s1936_s5 = scalar_lea.vmem %s109_s29, 256  ;;  %p1941_p12 = scmp.lt.s32.totalorder %s109_s29, %s109_s29 }
  0xa3   :  { %p1937_p11 = scmp.ne.s32.totalorder %s109_s29, %s1936_s5  ;;  %p1942_p13 = scmp.lt.s32.totalorder %s1936_s5, %s1936_s5 }
  0xa5   :  { %p1943_p0 = por %p1942_p13, %p1941_p12 }
  0xa7   :  { %p1944_p1 = pnand %p1943_p0, %p1937_p11 }
  0xa9   :  { %1947 = shalt.err (!%p1944_p1)
}
  0xaa   :  { %114 = dma.hbm_to_vmem [thread:$0]  %s2478_s7, 256, %s109_s29, [#allocation12], %s2054_s25, %s2054_s25, %s2055_s26  }
  0xab   :  { %s1948_s22 = scalar_lea.hbm %s2481_s10, 128 }
  0xac   :  { %p1949_p2 = scmp.ne.s32.totalorder %s2481_s10, %s1948_s22  ;;  %p1952_p3 = scmp.lt.u32.totalorder %s1948_s22, %s2481_s10 }
  0xae   :  { %p1954_p4 = pnand %p1952_p3, %p1949_p2 }
  0xb0   :  { %1957 = shalt.err (!%p1954_p4)
}
  0xb1   :  { %s1958_s4 = scalar_lea.vmem %s136_s28, 128  ;;  %p1963_p6 = scmp.lt.s32.totalorder %s136_s28, %s136_s28 }
  0xb2   :  { %p1959_p5 = scmp.ne.s32.totalorder %s136_s28, %s1958_s4  ;;  %p1964_p7 = scmp.lt.s32.totalorder %s1958_s4, %s1958_s4 }
  0xb4   :  { %p1965_p8 = por %p1964_p7, %p1963_p6 }
  0xb6   :  { %p1966_p9 = pnand %p1965_p8, %p1959_p5 }
  0xb8   :  { %1969 = shalt.err (!%p1966_p9)
}
  0xb9   :  { %138 = dma.hbm_to_vmem [thread:$0]  %s2481_s10, 128, %s136_s28, [#allocation15]  }
  0xba   :  { %s2064_s1 = smov [#allocation19]   ;;  %s2065_s23 = smov [#allocation20]  }
  0xbb   :  { %s158_s30 = sshll.u32 %s2064_s1, 4  ;;  %s172_s27 = sshll.u32 %s2065_s23, 4  ;;  %s159_s30 = int_to_ptr.vmem [resolvable:$true] %s158_s30  ;;  %s2332_s27 = int_to_ptr.vmem [resolvable:$true] %s172_s27 }
  0xbc   :  { %s1970_s11 = scalar_lea.hbm %s2485_s14, 512 }
  0xbd   :  { %p1971_p10 = scmp.ne.s32.totalorder %s2485_s14, %s1970_s11  ;;  %p1974_p11 = scmp.lt.u32.totalorder %s1970_s11, %s2485_s14 }
  0xbf   :  { %p1976_p12 = pnand %p1974_p11, %p1971_p10 }
  0xc1   :  { %1979 = shalt.err (!%p1976_p12)
}
  0xc2   :  { %s1980_s10 = scalar_lea.vmem %s159_s30, 512  ;;  %p1985_p0 = scmp.lt.s32.totalorder %s159_s30, %s159_s30 }
  0xc3   :  { %p1981_p13 = scmp.ne.s32.totalorder %s159_s30, %s1980_s10  ;;  %p1986_p1 = scmp.lt.s32.totalorder %s1980_s10, %s1980_s10 }
  0xc5   :  { %p1987_p2 = por %p1986_p1, %p1985_p0 }
  0xc7   :  { %p1988_p3 = pnand %p1987_p2, %p1981_p13 }
  0xc9   :  { %1991 = shalt.err (!%p1988_p3)
}
  0xca   :  { %164 = dma.hbm_to_vmem [thread:$0]  %s2485_s14, 512, %s159_s30, [#allocation18], %s2054_s25, %s2054_s25, %s2055_s26  }
  0xcb   :  { %s1992_s3 = scalar_lea.hbm %s2487_s16, 512 }
  0xcc   :  { %p1993_p4 = scmp.ne.s32.totalorder %s2487_s16, %s1992_s3  ;;  %p1996_p5 = scmp.lt.u32.totalorder %s1992_s3, %s2487_s16 }
  0xce   :  { %p1998_p6 = pnand %p1996_p5, %p1993_p4 }
  0xd0   :  { %2001 = shalt.err (!%p1998_p6)
}
  0xd1   :  { %s2002_s29 = scalar_lea.vmem %s2332_s27, 512  ;;  %p2007_p8 = scmp.lt.s32.totalorder %s2332_s27, %s2332_s27 }
  0xd2   :  { %p2003_p7 = scmp.ne.s32.totalorder %s2332_s27, %s2002_s29  ;;  %p2008_p9 = scmp.lt.s32.totalorder %s2002_s29, %s2002_s29 }
  0xd4   :  { %p2009_p10 = por %p2008_p9, %p2007_p8 }
  0xd6   :  { %p2010_p11 = pnand %p2009_p10, %p2003_p7 }
  0xd8   :  { %2013 = shalt.err (!%p2010_p11)
}
  0xd9   :  { %178 = dma.hbm_to_vmem [thread:$0]  %s2487_s16, 512, %s2332_s27, [#allocation21], %s2054_s25, %s2054_s25, %s2055_s26  }
  0xda   :  { %2036 = dma.done.wait [#allocation3], 256  }
  0xdb   :  { %2037 = vsyncadd [#allocation3], 4294967040 }
  0xdc   :  { %2038 = dma.done.wait [#allocation6], 512  }
  0xdd   :  { %2039 = vsyncadd [#allocation6], 4294966784 }
  0xde   :  { %2040 = dma.done.wait [#allocation9], 512  }
  0xdf   :  { %2041 = vsyncadd [#allocation9], 4294966784 }
  0xe0   :  { %2042 = dma.done.wait [#allocation12], 384  }
  0xe1   :  { %2043 = vsyncadd [#allocation12], 4294966912 }
  0xe2   :  { %2044 = dma.done.wait [#allocation15], 384  }
  0xe3   :  { %2045 = vsyncadd [#allocation15], 4294966912 }
  0xe4   :  { %2046 = dma.done.wait [#allocation18], 528  }
  0xe5   :  { %2047 = vsyncadd [#allocation18], 4294966768 }
  0xe6   :  { %2048 = dma.done.wait [#allocation21], 512  }
  0xe7   :  { %2049 = vsyncadd [#allocation21], 4294966784  ;;  %vm319_vm0 = vcmask 1043456   ;;  %vm312_vm1 = vcmask 97280   ;;  %vm2066_vm2 = vmmov 1   ;;  %s2502_s23 = sld [smem:[#allocation32_spill]] }
  0xe8   :  { %vm2369_vm3 = vmpackc.low %vm319_vm0, %vm2066_vm2  ;;  %v223_v3 = vld [vmem:[#allocation7] sm:$0xff]  ;;  %vm229_vm4 = vcmask 130048   ;;  %v218_v6 = vld [vmem:[#allocation2 + $0x8] sm:$0xff]  ;;  %vm398_vm5 = vcmask 64512   ;;  %vm1074_vm6 = vcmask 261120   ;;  %s2067_s16 = smov [#allocation22]  }
  0xe9   :  { %1557 = vmatprep.mubr.msk.f32.mxu1 %vm312_vm1, %v223_v3  ;;  %v217_v5 = vld [vmem:[#allocation2] sm:$0xff]  ;;  %v221_v8 = vld [vmem:[#allocation5] sm:$0xff]  ;;  %v2385_v10 = vld [vmem:[#allocation7 + $0x8] sm:$0xff]  ;;  %s1432_s30 = sshll.u32 %s2067_s16, 4  ;;  %s1433_s30 = int_to_ptr.vmem [resolvable:$true] %s1432_s30 }
  0xea   :  { %v1656_v7 = vpack.c.bf16 %v218_v6, %v217_v5  ;;  %1550 = vmatprep.mubr.msk.f32.mxu0 %vm229_vm4, %v221_v8  ;;  %v311_v9 = vld [vmem:[#allocation11] sm:$0xff]  ;;  %v2387_v11 = vld [vmem:[#allocation5 + $0x8] sm:$0xff]  ;;  %v227_v14 = vld [vmem:[#allocation10] sm:$0xff]  ;;  %p2019_p13 = scmp.lt.s32.totalorder %s1433_s30, %s1433_s30 }
  0xeb   :  { %v225_v12 = vld [vmem:[#allocation8] sm:$0xff]  ;;  %v226_v13 = vld [vmem:[#allocation8 + $0x8] sm:$0xf]  ;;  %v228_v15 = vld [vmem:[#allocation10 + $0x8] sm:$0xff] }
  0xec   :  { %1657 = vmatprep.subr.bf16.mxu0 %v1656_v7  ;;  %v1666_v16 = vpack.c.bf16 %v228_v15, %v227_v14  ;;  %v740_v17 = vld [vmem:[#allocation16] sm:$0xff]  ;;  %v657_v18 = vld [vmem:[#allocation14] sm:$0xff]  ;;  %v658_v19 = vld [vmem:[#allocation14 + $0x8] sm:$0xff] }
  0xed   :  { %v219_v1 = vld [vmem:[%s2502_s23] sm:$0xff]  ;;  %v220_v2 = vld [vmem:[%s2502_s23 + $0x8] sm:$0xf]  ;;  %1659 = vmatpush3.bf16.msra.mxu0 %v1656_v7  ;;  %v1678_v20 = vpack.c.bf16 %v658_v19, %v657_v18  ;;  %v561_v21 = vld [vmem:[#allocation13] sm:$0xff] }
  0xee   :  { %v1660_v4 = vpack.c.bf16 %v220_v2, %v219_v1  ;;  %1560 = vmatprep.subr.mxu0 %v311_v9  ;;  %v562_v22 = vld [vmem:[#allocation13 + $0x8] sm:$0xff]  ;;  %v914_v45 = vld [vmem:[%s2483_s12 + $0x8] sm:$0xff]  ;;  %v915_v49 = vld [vmem:[%s2483_s12 + $0x10] sm:$0xff] }
  0xef   :  { %v1670_v26 = vpack.c.bf16 %v562_v22, %v561_v21  ;;  %v1468_v30 = vld [vmem:[#allocation17] ss:$0 sm:$0xff]  ;;  %v916_v50 = vld [vmem:[%s2483_s12 + $0x18] sm:$0xff]  ;;  %v993_v53 = vld [vmem:[%s2484_s13 + $0x8] sm:$0xff] }
  0xf0   :  { %1662 = vmatprep.subr.msk.bf16.mxu1 %vm2369_vm3, %v1660_v4  ;;  %1551 = vmatmul.mubr.msk.f32.vlgmr.msra.gmra.mrb[0].mxu0 %vm229_vm4, %v2387_v11  ;;  %v1461_v38 = vld [vmem:[%s2479_s8] ss:$0 sm:$0xff]  ;;  %v1704_v51 = vpack.c.bf16 %v916_v50, %v915_v49  ;;  %v1237_v55 = vld [vmem:[#allocation19] sm:$0xff]  ;;  %v1238_v56 = vld [vmem:[#allocation19 + $0x8] sm:$0xff] }
  0xf1   :  { %1665 = vmatpush3.bf16.msk.msra.mxu1 %vm2369_vm3, %v1660_v4  ;;  %1561 = vmatpush3.msra.mxu0 %v311_v9  ;;  %v913_v44 = vld [vmem:[%s2483_s12] sm:$0xff]  ;;  %v1708_v57 = vpack.c.bf16 %v1238_v56, %v1237_v55  ;;  %v994_v58 = vld [vmem:[%s2484_s13 + $0x10] sm:$0xff]  ;;  %v995_v59 = vld [vmem:[%s2484_s13 + $0x18] sm:$0xff] }
  0xf2   :  { %1675 = vmatprep.subr.bf16.mxu1 %v1656_v7  ;;  %1667 = vmatprep.subr.bf16.mxu0 %v1666_v16  ;;  %v1700_v48 = vpack.c.bf16 %v914_v45, %v913_v44  ;;  %v992_v52 = vld [vmem:[%s2484_s13] sm:$0xff]  ;;  %v1696_v60 = vpack.c.bf16 %v995_v59, %v994_v58  ;;  %v1239_v63 = vld [vmem:[#allocation19 + $0x10] sm:$0xff] }
  0xf3   :  { %v1692_v54 = vpack.c.bf16 %v993_v53, %v992_v52  ;;  %v1240_v0 = vld [vmem:[#allocation19 + $0x18] sm:$0xff]  ;;  %v1333_v4 = vld [vmem:[#allocation20] sm:$0xff] }
  0xf4   :  { %1558 = vmatmul.mubr.msk.f32.vlgmr.msra.gmra.mrb[0].mxu1 %vm312_vm1, %v2385_v10  ;;  %v1480_v14 = vld [vmem:[%s2486_s15] ss:$0 sm:$0xff]  ;;  %s2014_s15 = scalar_lea.vmem %s1433_s30, 256 }
  0xf5   :  { %1677 = vmatpush3.bf16.msra.mxu1 %v1656_v7  ;;  %1583 = vmatprep.mubr.msk.f32.mxu1 %vm229_vm4, %v225_v12  ;;  %v1335_v7 = vld [vmem:[#allocation20 + $0x10] sm:$0xff]  ;;  %v1481_v19 = vld [vmem:[%s2488_s17] ss:$0 sm:$0xff]  ;;  %p2015_p12 = scmp.ne.s32.totalorder %s1433_s30, %s2014_s15  ;;  %p2020_p0 = scmp.lt.s32.totalorder %s2014_s15, %s2014_s15 }
  0xf6   :  { %1586 = vmatprep.subr.mxu1 %v740_v17 }
  0xf7   :  { %p2021_p1 = por %p2020_p0, %p2019_p13 }
  0xf8   :  { %1584 = vmatmul.mubr.msk.f32.vlgmr.msra.gmra.mrb[2].mxu1 %vm229_vm4, %v226_v13 }
  0xf9   :  { %1588 = vmatprep.mubr.msk.f32.mxu1 %vm398_vm5, %v219_v1  ;;  %1587 = vmatpush3.msra.mxu1 %v740_v17  ;;  %p2022_p2 = pnand %p2021_p1, %p2015_p12 }
  0xfa   :  { %1679 = vmatprep.subr.bf16.mxu1 %v1678_v20 }
  0xfc   :  { %1589 = vmatmul.mubr.msk.f32.vlgmr.msra.gmra.mrb[4].mxu1 %vm398_vm5, %v220_v2 }
  0xfd   :  { %1681 = vmatpush3.bf16.msra.mxu1 %v1678_v20 }
 0x1c3   :  { %v1552_v25 = vpop.f32.mrb[0].mxu0 }
 0x1c4   :  { %v302_v27 = vpop.f32.mrb[1].mxu0 }
 0x1c7   :  { %v1559_v23 = vpop.f32.mrb[0].mxu1 }
 0x1c8   :  { %v389_v24 = vpop.f32.mrb[1].mxu1 }
 0x1c9   :  { %1562 = vmatprep.mubr.msk.f32.mxu0 %vm398_vm5, %v389_v24 }
 0x1ca   :  { %1563 = vmatmul.mubr.msk.f32.vlgmr.msra.gmra.mrb[2].mxu0 %vm398_vm5, %v1559_v23 }
 0x1cb   :  { %1669 = vmatpush3.bf16.msra.mxu0 %v1666_v16  ;;  %1569 = vmatprep.mubr.msk.f32.mxu0 %vm229_vm4, %v302_v27  ;;  %v1585_v28 = vpop.f32.mrb[2].mxu1 }
 0x1cc   :  { %1671 = vmatprep.subr.bf16.mxu0 %v1670_v26  ;;  %v731_v29 = vpop.f32.mrb[3].mxu1 }
 0x1cd   :  { %1595 = vmatprep.mubr.msk.f32.mxu1 %vm229_vm4, %v731_v29 }
 0x1ce   :  { %1596 = vmatmul.mubr.msk.f32.vlgmr.msra.gmra.mrb[4].mxu1 %vm229_vm4, %v1585_v28 }
 0x1cf   :  { %1609 = vmatprep.mubr.msk.f32.mxu1 %vm312_vm1, %v223_v3  ;;  %v1712_v3 = vpack.c.bf16 %v1240_v0, %v1239_v63 }
 0x1d2   :  { %1570 = vmatmul.mubr.msk.f32.vlgmr.msra.gmra.mrb[2].mxu0 %vm229_vm4, %v1552_v25 }
 0x1d3   :  { %1673 = vmatpush3.bf16.msra.mxu0 %v1670_v26  ;;  %1576 = vmatprep.mubr.msk.f32.mxu0 %vm229_vm4, %v217_v5  ;;  %v1334_v5 = vld [vmem:[#allocation20 + $0x8] sm:$0xff] }
 0x1da   :  { %1577 = vmatmul.mubr.msk.f32.vlgmr.msra.gmra.mrb[2].mxu0 %vm229_vm4, %v218_v6  ;;  %v1716_v6 = vpack.c.bf16 %v1334_v5, %v1333_v4 }
 0x1db   :  { %1602 = vmatprep.mubr.msk.f32.mxu0 %vm229_vm4, %v221_v8  ;;  %v1336_v8 = vld [vmem:[#allocation20 + $0x18] sm:$0xff] }
 0x1dc   :  { %v1720_v9 = vpack.c.bf16 %v1336_v8, %v1335_v7 }
 0x2a1   :  { %v1597_v31 = vpop.f32.mrb[4].mxu1 }
 0x2a2   :  { %v910_v32 = vadd.f32 %v1597_v31, %v1468_v30  ;;  %v893_v33 = vpop.f32.mrb[5].mxu1 }
 0x2a3   :  { %v909_v34 = vadd.f32 %v1468_v30, %v893_v33 }
 0x2a4   :  { %v912_v35 = vmax.f32 %v910_v32, 0.0 }
 0x2a5   :  { %v911_v36 = vmax.f32 %v909_v34, 0.0 }
 0x2a7   :  { %v1686_v37 = vpack.c.bf16 %v912_v35, %v911_v36 }
 0x2a9   :  { %1688 = vmatprep.subr.msk.bf16.mxu1 %vm2369_vm3, %v1686_v37 }
 0x2aa   :  { %1691 = vmatpush3.bf16.msk.msra.mxu1 %vm2369_vm3, %v1686_v37 }
 0x2ab   :  { %1693 = vmatprep.subr.bf16.mxu1 %v1692_v54 }
 0x2ad   :  { %v1578_v39 = vpop.f32.mrb[2].mxu0  ;;  %1610 = vmatmul.mubr.msk.f32.vlgmr.msra.gmra.mrb[6].mxu1 %vm312_vm1, %v2385_v10 }
 0x2ae   :  { %v654_v40 = vadd.f32 %v1578_v39, %v1461_v38  ;;  %v635_v41 = vpop.f32.mrb[3].mxu0  ;;  %1695 = vmatpush3.bf16.msra.mxu1 %v1692_v54 }
 0x2af   :  { %v653_v42 = vadd.f32 %v1461_v38, %v635_v41  ;;  %1697 = vmatprep.subr.bf16.mxu1 %v1696_v60 }
 0x2b0   :  { %v656_v43 = vmax.f32 %v654_v40, 0.0 }
 0x2b1   :  { %v655_v46 = vmax.f32 %v653_v42, 0.0 }
 0x2b2   :  { %1699 = vmatpush3.bf16.msra.mxu1 %v1696_v60 }
 0x2b3   :  { %v1682_v47 = vpack.c.bf16 %v656_v43, %v655_v46  ;;  %1717 = vmatprep.subr.bf16.mxu1 %v1716_v6 }
 0x2b5   :  { %1683 = vmatprep.subr.bf16.mxu0 %v1682_v47 }
 0x2b6   :  { %1685 = vmatpush3.bf16.msra.mxu0 %v1682_v47 }
 0x2b7   :  { %1701 = vmatprep.subr.bf16.mxu0 %v1700_v48 }
 0x2b9   :  { %1603 = vmatmul.mubr.msk.f32.vlgmr.msra.gmra.mrb[4].mxu0 %vm229_vm4, %v2387_v11 }
 0x2ba   :  { %1703 = vmatpush3.bf16.msra.mxu0 %v1700_v48 }
 0x2bb   :  { %1705 = vmatprep.subr.bf16.mxu0 %v1704_v51 }
 0x2be   :  { %1707 = vmatpush3.bf16.msra.mxu0 %v1704_v51 }
 0x2bf   :  { %1709 = vmatprep.subr.bf16.mxu0 %v1708_v57 }
 0x380   :  { %v1611_v61 = vpop.f32.mrb[6].mxu1 }
 0x381   :  { %v1065_v62 = vpop.f32.mrb[7].mxu1 }
 0x382   :  { %1620 = vmatprep.mubr.msk.f32.mxu1 %vm1074_vm6, %v1065_v62 }
 0x383   :  { %1621 = vmatmul.mubr.msk.f32.vlgmr.msra.gmra.mrb[8].mxu1 %vm1074_vm6, %v1611_v61 }
 0x384   :  { %1719 = vmatpush3.bf16.msra.mxu1 %v1716_v6 }
 0x385   :  { %1721 = vmatprep.subr.bf16.mxu1 %v1720_v9 }
 0x388   :  { %1723 = vmatpush3.bf16.msra.mxu1 %v1720_v9 }
 0x38c   :  { %v1604_v1 = vpop.f32.mrb[4].mxu0 }
 0x38d   :  { %v983_v2 = vpop.f32.mrb[5].mxu0 }
 0x38e   :  { %1631 = vmatprep.mubr.msk.f32.mxu0 %vm1074_vm6, %v983_v2 }
 0x38f   :  { %1632 = vmatmul.mubr.msk.f32.vlgmr.msra.gmra.mrb[6].mxu0 %vm1074_vm6, %v1604_v1 }
 0x390   :  { %1711 = vmatpush3.bf16.msra.mxu0 %v1708_v57  ;;  %1642 = vmatprep.mubr.msk.f32.mxu0 %vm1074_vm6, %v655_v46 }
 0x391   :  { %1713 = vmatprep.subr.bf16.mxu0 %v1712_v3 }
 0x394   :  { %1715 = vmatpush3.bf16.msra.mxu0 %v1712_v3 }
 0x397   :  { %1643 = vmatmul.mubr.msk.f32.vlgmr.msra.gmra.mrb[6].mxu0 %vm1074_vm6, %v656_v43 }
 0x456   :  { %v1622_v10 = vpop.f32.mrb[8].mxu1 }
 0x457   :  { %v1147_v11 = vpop.f32.mrb[9].mxu1 }
 0x46a   :  { %v1644_v12 = vpop.f32.mrb[6].mxu0 }
 0x46b   :  { %v1724_v13 = vadd.f32 %v1644_v12, %v1622_v10  ;;  %v1313_v15 = vpop.f32.mrb[7].mxu0 }
 0x46c   :  { %v1725_v16 = vadd.f32 %v1313_v15, %v1147_v11 }
 0x46d   :  { %v1332_v18 = vadd.f32 %v1724_v13, %v1480_v14 }
 0x46e   :  { %v1331_v17 = vadd.f32 %v1725_v16, %v1480_v14 }
 0x470   :  { %1653 = vmatprep.mubr.msk.f32.mxu1 %vm1074_vm6, %v1331_v17 }
 0x471   :  { %1654 = vmatmul.mubr.msk.f32.vlgmr.msra.gmra.mrb[10].mxu1 %vm1074_vm6, %v1332_v18 }
 0x544   :  { %v1655_v20 = vpop.f32.mrb[10].mxu1 }
 0x545   :  { %v1422_v21 = vadd.f32 %v1655_v20, %v1481_v19  ;;  %v1416_v22 = vpop.f32.mrb[11].mxu1 }
 0x546   :  { %v1417_v23 = vadd.f32 %v1481_v19, %v1416_v22 }
 0x547   :  { %1426 = vst [vmem:[#allocation22 + $0x8] sm:$0xff] %v1422_v21 }
 0x548   :  { %1425 = vst [vmem:[#allocation22] sm:$0xff] %v1417_v23 }
 0x549   :  { %2025 = shalt.err (!%p2022_p2)
}
 0x54a   :  { %s2503_s0 = sld [smem:[#allocation34_spill]] }
 0x550   :  { %s2026_s17 = scalar_lea.hbm %s2503_s0, 256 }
 0x551   :  { %p2027_p3 = scmp.ne.s32.totalorder %s2503_s0, %s2026_s17  ;;  %p2030_p4 = scmp.lt.u32.totalorder %s2026_s17, %s2503_s0 }
 0x553   :  { %p2032_p5 = pnand %p2030_p4, %p2027_p3 }
 0x555   :  { %2035 = shalt.err (!%p2032_p5)
}
 0x556   :  { %1438 = dma.vmem_to_hbm [thread:$0]  %s1433_s30, 256, %s2503_s0, [#allocation4], %s2054_s25, %s2054_s25, %s2055_s26  }
 0x557   :  { %2050 = dma.done.wait [#allocation4], 256  }
 0x558   :  { %2051 = vsyncadd [#allocation4], 4294967040 }
 0x559   :  { %1442 = vsyncpa [#allocation3], 1 }
 0x55a   :  { %1443 = vsyncpa [#allocation6], 1 }
 0x55b   :  { %1444 = vsyncpa [#allocation9], 1 }
 0x55c   :  { %1445 = vsyncpa [#allocation12], 1 }
 0x55d   :  { %1446 = vsyncpa [#allocation15], 1 }
 0x55e   :  { %1447 = vsyncpa [#allocation18], 1 }
 0x55f   :  { %1448 = vsyncpa [#allocation21], 1 }
 0x560   :  { %1449 = vsyncpa [#allocation4], 1 }

</bundles_post_ra>
